<compile_context>
chip_gen: v7x
topology: tpu7x:2x2x1
jax: 0.10.0
libtpu: 0.0.40
codegen_flags: <defaults>
</compile_context>

<pallas_src>
import functools

import jax
import jax.numpy as jnp
from jax import lax
from jax.experimental import pallas as pl
from jax.experimental.pallas import tpu as pltpu


def _round_up(x, m):
    return ((x + m - 1) // m) * m


def _largest_divisor(dim, candidates):
    for c in candidates:
        if c <= dim and dim % c == 0:
            return c
    return dim


# ---------------------------------------------------------------------------
# Tiled matmul kernels (MXU hot path):  C = A @ B, f32 accumulation.
# Used only once per loss evaluation: the fused GCN aggregation
#   agg_all = [x^T ; h_st_1 ; ...] @ A_norm   (bf16 operands, f32 output).
# Caller guarantees padded shapes: M % 8 == 0, K % 128 == 0, N % 128 == 0.
# ---------------------------------------------------------------------------
def _matmul_kernel_acc(a_ref, b_ref, o_ref, acc_ref):
    @pl.when(pl.program_id(2) == 0)
    def _():
        acc_ref[...] = jnp.zeros_like(acc_ref)

    acc_ref[...] += jnp.dot(a_ref[...], b_ref[...],
                            preferred_element_type=jnp.float32)

    @pl.when(pl.program_id(2) == pl.num_programs(2) - 1)
    def _():
        o_ref[...] = acc_ref[...].astype(o_ref.dtype)


def _matmul_kernel_single_k(a_ref, b_ref, o_ref):
    # K fits in one tile: write straight to the output, no scratch / zero-fill.
    o_ref[...] = jnp.dot(a_ref[...], b_ref[...],
                         preferred_element_type=jnp.float32).astype(o_ref.dtype)


def pallas_matmul_padded(a, b, tn=512, tk=1024):
    """C = A @ B with pre-padded A:(M,K), B:(K,N); f32 output."""
    M, K = a.shape
    K2, N = b.shape
    assert K == K2 and K % 128 == 0 and N % 128 == 0 and M % 8 == 0

    tm = M if M <= 512 else _largest_divisor(M, (512, 256, 128, 64, 32, 16, 8))
    tn = _largest_divisor(N, (tn, 512, 256, 128))
    tk = _largest_divisor(K, (tk, 1024, 512, 256, 128))

    esz = jnp.dtype(a.dtype).itemsize
    # 2x double-buffered inputs + double-buffered f32 output + f32 accumulator.
    need = (2 * tm * tk * esz + 2 * tk * tn * esz
            + 2 * tm * tn * 4 + tm * tn * 4 + (2 << 20))
    vmem = int(min(max(need, 8 << 20), 32 << 20))   # safe for v7x (64 MiB phys)

    if K == tk:
        return pl.pallas_call(
            _matmul_kernel_single_k,
            out_shape=jax.ShapeDtypeStruct((M, N), jnp.float32),
            grid_spec=pltpu.PrefetchScalarGridSpec(
                num_scalar_prefetch=0,
                grid=(M // tm, N // tn),
                in_specs=[pl.BlockSpec((tm, K), lambda i, j: (i, 0)),
                          pl.BlockSpec((K, tn), lambda i, j: (0, j))],
                out_specs=pl.BlockSpec((tm, tn), lambda i, j: (i, j))),
            compiler_params=pltpu.CompilerParams(
                dimension_semantics=("parallel", "parallel"),
                vmem_limit_bytes=vmem),
        )(a, b)

    return pl.pallas_call(
        _matmul_kernel_acc,
        out_shape=jax.ShapeDtypeStruct((M, N), jnp.float32),
        grid_spec=pltpu.PrefetchScalarGridSpec(
            num_scalar_prefetch=0,
            grid=(M // tm, N // tn, K // tk),
            in_specs=[pl.BlockSpec((tm, tk), lambda i, j, k: (i, k)),
                      pl.BlockSpec((tk, tn), lambda i, j, k: (k, j))],
            out_specs=pl.BlockSpec((tm, tn), lambda i, j, k: (i, j)),
            scratch_shapes=[pltpu.VMEM((tm, tn), jnp.float32)]),
        compiler_params=pltpu.CompilerParams(
            dimension_semantics=("parallel", "parallel", "arbitrary"),
            vmem_limit_bytes=vmem),
    )(a, b)


# ---------------------------------------------------------------------------
# Fused, N-gridded GCKMLayer.loss kernel (Gram matrix K never materialized):
#   l1  = gamma * (-1/2) * trace(Hc K Hc^T) / n ,  K = agg agg^T ,
#       = gamma * (-1/2) * ||Hc @ agg||_F^2 / n ,  Hc = H - rowmean(H)
#   ort = ||H H^T - I||_F^2 / n
# agg is the lane-dense aggregated features in (C, N) layout.  Per N-block we
# accumulate  MA = H agg^T , rowsum(H), rowsum(agg), H H^T  and finalize via
#   Hc agg^T = MA - (rowsum(H)/n) outer rowsum(agg).
# Zero column-padding of H / agg leaves every accumulator unchanged.
# ---------------------------------------------------------------------------
def _gckm_loss_kernel(h_ref, agg_ref, ener_ref, ort_ref,
                      ma_ref, rsh_ref, csa_ref, gram_ref, *, gamma, n):
    j = pl.program_id(0)

    @pl.when(j == 0)
    def _():
        ma_ref[...] = jnp.zeros_like(ma_ref)
        rsh_ref[...] = jnp.zeros_like(rsh_ref)
        csa_ref[...] = jnp.zeros_like(csa_ref)
        gram_ref[...] = jnp.zeros_like(gram_ref)

    h = h_ref[...]                                            # (S, bn)
    agg = agg_ref[...]                                        # (C, bn)
    ma_ref[...] += lax.dot_general(h, agg, (((1,), (1,)), ((), ())),
                                   preferred_element_type=jnp.float32)   # (S, C)
    gram_ref[...] += lax.dot_general(h, h, (((1,), (1,)), ((), ())),
                                     preferred_element_type=jnp.float32)  # (S, S)
    rsh_ref[...] += jnp.sum(h, axis=1, keepdims=True)          # (S, 1)
    csa_ref[...] += jnp.sum(agg, axis=1, keepdims=True)        # (C, 1)

    @pl.when(j == pl.num_programs(0) - 1)
    def _():
        outer = lax.dot_general(rsh_ref[...], csa_ref[...],
                                (((1,), (1,)), ((), ())),
                                preferred_element_type=jnp.float32)       # (S, C)
        m = ma_ref[...] - outer / n
        ener_ref[0, 0] = gamma * (-0.5) * jnp.sum(m * m) / n
        s = gram_ref.shape[0]
        eye = (lax.broadcasted_iota(jnp.int32, (s, s), 0)
               == lax.broadcasted_iota(jnp.int32, (s, s), 1)).astype(jnp.float32)
        o = gram_ref[...] - eye
        ort_ref[0, 0] = jnp.sum(o * o) / n


def gckm_layer_loss(h_pad, agg_pad, gamma, n_true, bn):
    s, npad = h_pad.shape
    c = agg_pad.shape[0]
    kern = functools.partial(_gckm_loss_kernel, gamma=float(gamma), n=float(n_true))
    ener, ort = pl.pallas_call(
        kern,
        out_shape=(jax.ShapeDtypeStruct((1, 1), jnp.float32),
                   jax.ShapeDtypeStruct((1, 1), jnp.float32)),
        grid_spec=pltpu.PrefetchScalarGridSpec(
            num_scalar_prefetch=0,
            grid=(npad // bn,),
            in_specs=[pl.BlockSpec((s, bn), lambda j: (0, j)),
                      pl.BlockSpec((c, bn), lambda j: (0, j))],
            out_specs=(pl.BlockSpec(memory_space=pltpu.MemorySpace.SMEM),
                       pl.BlockSpec(memory_space=pltpu.MemorySpace.SMEM)),
            scratch_shapes=[pltpu.VMEM((s, c), jnp.float32),
                            pltpu.VMEM((s, 1), jnp.float32),
                            pltpu.VMEM((c, 1), jnp.float32),
                            pltpu.VMEM((s, s), jnp.float32)]),
        compiler_params=pltpu.CompilerParams(dimension_semantics=("arbitrary",)),
    )(h_pad, agg_pad)
    return ener[0, 0], ort[0, 0]


# ---------------------------------------------------------------------------
# Fused, N-gridded SemiSupRkmLayer.loss kernel (kernel matrix K fused away).
# Two passes over N (grid axis 0 of size 2):
#   pass 0: rs = rowsum(xt) over N                 (xt = h_last, (S, N))
#   pass 1 per block: d = xt^T rs ; r = 1/(d lam1) - l/lam2 (masked to true N)
#           accumulate  m += (H diag r) xt_blk^T , t2 += sum(r colsum(H^2)),
#                       t3 += sum(H * C^T),  zsum += sum(H * r)
# Finalize:  t1 = ||m||_F^2 ;  loss = -t1/2 + t2/2 - t3/lam2 ;
#            ener = gamma loss / n ;  zs = zsum^2 / n
# ---------------------------------------------------------------------------
def _semisup_loss_kernel(xt_ref, h_ref, ct_ref, l_ref, ener_ref, zs_ref,
                         rs_ref, m_ref, t2_ref, t3_ref, zsum_ref, *,
                         gamma, lam1, lam2, n, n_true):
    p = pl.program_id(0)
    j = pl.program_id(1)
    bn = xt_ref.shape[1]

    @pl.when((p == 0) & (j == 0))
    def _():
        rs_ref[...] = jnp.zeros_like(rs_ref)
        m_ref[...] = jnp.zeros_like(m_ref)
        t2_ref[...] = jnp.zeros_like(t2_ref)
        t3_ref[...] = jnp.zeros_like(t3_ref)
        zsum_ref[...] = jnp.zeros_like(zsum_ref)

    @pl.when(p == 0)
    def _():
        rs_ref[...] += jnp.sum(xt_ref[...], axis=1, keepdims=True)   # (S, 1)

    @pl.when(p == 1)
    def _():
        xt = xt_ref[...]                                       # (S, bn)
        h = h_ref[...]                                         # (P, bn)
        ct = ct_ref[...]                                       # (P, bn)
        lrow = l_ref[...]                                      # (1, bn)

        d = jnp.sum(xt * rs_ref[...], axis=0, keepdims=True)   # (1, bn) = rowsum(K)
        col = lax.broadcasted_iota(jnp.int32, (1, bn), 1) + j * bn
        mask = col < n_true                                    # true-N column mask
        d_safe = jnp.where(mask, d, 1.0)
        r = jnp.where(mask, 1.0 / (d_safe * lam1) - lrow / lam2, 0.0)

        g = h * r                                              # (P, bn) = H diag(r)
        m_ref[...] += lax.dot_general(g, xt, (((1,), (1,)), ((), ())),
                                      preferred_element_type=jnp.float32)  # (P, S)
        hh = jnp.sum(h * h, axis=0, keepdims=True)             # (1, bn)
        t2_ref[...] += jnp.sum(r * hh, axis=1, keepdims=True)
        t3_ref[...] += jnp.sum(jnp.sum(h * ct, axis=0, keepdims=True),
                               axis=1, keepdims=True)
        zsum_ref[...] += jnp.sum(jnp.sum(g, axis=0, keepdims=True),
                                 axis=1, keepdims=True)

    @pl.when((p == 1) & (j == pl.num_programs(1) - 1))
    def _():
        mm = m_ref[...]
        t1 = jnp.sum(mm * mm)                                  # trace(H R K R H^T)
        t2 = jnp.sum(t2_ref[...])                              # trace(H R H^T)
        t3 = jnp.sum(t3_ref[...])                              # trace(H @ C)
        loss = -0.5 * t1 + 0.5 * t2 - t3 / lam2
        ener_ref[0, 0] = gamma * loss / n
        zsum = jnp.sum(zsum_ref[...])
        zs_ref[0, 0] = zsum * zsum / n


def semisup_layer_loss(h_last_pad, h_class_pad, ct_pad, l_pad,
                       gamma, lam1, lam2, n_true, bn):
    s, npad = h_last_pad.shape
    p = h_class_pad.shape[0]
    kern = functools.partial(_semisup_loss_kernel, gamma=float(gamma),
                             lam1=float(lam1), lam2=float(lam2),
                             n=float(n_true), n_true=int(n_true))
    ener, zs = pl.pallas_call(
        kern,
        out_shape=(jax.ShapeDtypeStruct((1, 1), jnp.float32),
                   jax.ShapeDtypeStruct((1, 1), jnp.float32)),
        grid_spec=pltpu.PrefetchScalarGridSpec(
            num_scalar_prefetch=0,
            grid=(2, npad // bn),
            in_specs=[pl.BlockSpec((s, bn), lambda pp, j: (0, j)),
                      pl.BlockSpec((p, bn), lambda pp, j: (0, j)),
                      pl.BlockSpec((p, bn), lambda pp, j: (0, j)),
                      pl.BlockSpec((1, bn), lambda pp, j: (0, j))],
            out_specs=(pl.BlockSpec(memory_space=pltpu.MemorySpace.SMEM),
                       pl.BlockSpec(memory_space=pltpu.MemorySpace.SMEM)),
            scratch_shapes=[pltpu.VMEM((s, 1), jnp.float32),
                            pltpu.VMEM((p, s), jnp.float32),
                            pltpu.VMEM((1, 1), jnp.float32),
                            pltpu.VMEM((1, 1), jnp.float32),
                            pltpu.VMEM((1, 1), jnp.float32)]),
        compiler_params=pltpu.CompilerParams(
            dimension_semantics=("arbitrary", "arbitrary")),
    )(h_last_pad, h_class_pad, ct_pad, l_pad)
    return ener[0, 0], zs[0, 0]


# ---------------------------------------------------------------------------
# DeepGCKM.loss() driver (glue is plain JAX, hot paths are the kernels above).
# A_norm symmetric  =>  (A_norm @ z^T)^T == z @ A_norm, so ALL per-layer
# aggregations are computed in ONE bf16 matmul pass over A_norm with a stacked
# lane-dense LHS, then sliced per layer.  Nothing (N, N)-sized besides A_norm
# itself ever touches HBM, and A_norm is streamed exactly once.
# ---------------------------------------------------------------------------
def deep_gckm_loss(x, a_norm, gckm_params, ss_params):
    n, dfeat = x.shape
    num_layers = len(gckm_params)
    npad = _round_up(n, 128)
    bn = _largest_divisor(npad, (2048, 1024, 512, 256, 128))

    def pad_cols(arr):
        return jnp.pad(arr, ((0, 0), (0, npad - arr.shape[1])))

    # --- single fused aggregation pass over A_norm (bf16 operands, f32 acc) ---
    rows = [x.T] + [gckm_params[i]["h_st"] for i in range(num_layers - 1)]
    stacked = jnp.concatenate(rows, axis=0)                    # (R, n) f32
    r_rows = stacked.shape[0]
    r_pad = _round_up(r_rows, 8)
    stacked = jnp.pad(stacked, ((0, r_pad - r_rows), (0, npad - n)))
    a_pad = jnp.pad(a_norm, ((0, npad - n), (0, npad - n)))
    agg_all = pallas_matmul_padded(stacked.astype(jnp.bfloat16),
                                   a_pad.astype(jnp.bfloat16))  # (r_pad, npad) f32

    tot_ener = jnp.float32(0.0)
    tot_orto = jnp.float32(0.0)
    row_off = 0
    prev_rows = dfeat          # layer-0 agg rows come from x^T
    prev_h_pad = None
    for li, lp in enumerate(gckm_params):
        h_pad = pad_cols(lp["h_st"])                           # (S, npad)
        agg_li = agg_all[row_off:row_off + prev_rows]          # (C, npad), lane-dense
        ener, ort = gckm_layer_loss(h_pad, agg_li, lp["gamma"], n, bn)
        tot_ener = tot_ener + ener
        tot_orto = tot_orto + ort
        row_off += prev_rows
        prev_rows = lp["h_st"].shape[0]
        prev_h_pad = h_pad                                     # layer.predict() = h_st.T

    ct_pad = pad_cols(ss_params["c"].T)                        # (P, npad), lane-dense
    hclass_pad = pad_cols(ss_params["h_class"])                # (P, npad)
    l_pad = pad_cols(ss_params["l"].reshape(1, n))             # (1, npad)
    ener_ss, zs = semisup_layer_loss(
        prev_h_pad, hclass_pad, ct_pad, l_pad,
        ss_params["gamma"], ss_params["lam1"], ss_params["lam2"], n, bn)
    tot_ener = tot_ener + ener_ss
    return tot_ener, tot_orto / num_layers, zs


# ---------------------------------------------------------------------------
# Pure-JAX f32 reference mirroring the PyTorch formulas (verification only).
# ---------------------------------------------------------------------------
def reference_loss(x, a_norm, gckm_params, ss_params):
    n = x.shape[0]
    tot_e, tot_o = 0.0, 0.0
    for lp in gckm_params:
        h = lp["h_st"]
        a = a_norm @ x
        k = a @ a.T
        mc = jnp.eye(n, dtype=jnp.float32) - jnp.ones((n, n), jnp.float32) / n
        l1 = -0.5 * jnp.trace(h @ mc @ k @ mc @ h.T)
        tot_e = tot_e + lp["gamma"] * l1 / n
        o = h @ h.T - jnp.eye(h.shape[0], dtype=jnp.float32)
        tot_o = tot_o + jnp.sum(o * o) / n
        x = h.T
    H = ss_params["h_class"]
    c = ss_params["c"]
    lvec = ss_params["l"]
    lam1, lam2, gamma = ss_params["lam1"], ss_params["lam2"], ss_params["gamma"]
    k = x @ x.T
    d = jnp.sum(k, axis=1)
    r = (1.0 / d) / lam1 - lvec / lam2
    rmat = jnp.diag(r)
    loss = (-0.5 * jnp.trace(H @ rmat @ k @ rmat @ H.T)
            + 0.5 * jnp.trace(H @ rmat @ H.T)
            - jnp.trace(H @ c) / lam2)
    zs = (jnp.sum(r @ H.T) ** 2) / n
    tot_e = tot_e + gamma * loss / n
    return tot_e, tot_o / len(gckm_params), zs


def build_gcn_norm_adj(key, n):
    """Dense GCN-normalized adjacency D^-1/2 (A + I) D^-1/2 (plain-JAX glue)."""
    a = jax.random.bernoulli(key, 0.1, (n, n)).astype(jnp.float32)
    a = jnp.maximum(a, a.T)                          # undirected -> symmetric
    eye = jnp.eye(n, dtype=jnp.float32)
    a = a * (1.0 - eye) + eye                        # add self loops
    deg = jnp.sum(a, axis=0)                         # degree(col)
    dis = jnp.where(deg > 0, 1.0 / jnp.sqrt(deg), 0.0)
    return a * dis[:, None] * dis[None, :]           # symmetric


if __name__ == "__main__":
    key = jax.random.PRNGKey(0)
    n, d, s, p = 128, 32, 16, 8        # nodes, feat dim, latent dim, #classes
    num_layers = 2
    gamma, lam1, lam2 = 1.0, 1.0, 0.5

    keys = jax.random.split(key, 8)
    x = jax.random.normal(keys[0], (n, d), dtype=jnp.float32)
    a_norm = build_gcn_norm_adj(keys[1], n)
    # The fused single-pass aggregation relies on A_norm being exactly
    # symmetric (true for GCN normalization of an undirected graph).
    assert bool(jnp.allclose(a_norm, a_norm.T))

    # Deterministic synthetic parameter init (stands in for torch.randn init;
    # shifted positive so kernel-matrix degrees are well conditioned).
    gckm_params = []
    for i in range(num_layers):
        h_st = jnp.abs(jax.random.normal(keys[2 + i], (s, n), dtype=jnp.float32)) + 0.1
        gckm_params.append({"h_st": h_st, "gamma": gamma})

    h_class = jax.random.normal(keys[4], (p, n), dtype=jnp.float32)
    c = jax.random.normal(keys[5], (n, p), dtype=jnp.float32)
    lvec = jax.random.bernoulli(keys[6], 0.3, (n,)).astype(jnp.float32)
    ss_params = {"h_class": h_class, "c": c, "l": lvec,
                 "gamma": gamma, "lam1": lam1, "lam2": lam2}

    tot_ener, tot_orto, zs = deep_gckm_loss(x, a_norm, gckm_params, ss_params)
    jax.block_until_ready((tot_ener, tot_orto, zs))

    r_ener, r_orto, r_zs = reference_loss(x, a_norm, gckm_params, ss_params)
    # The energy term uses bf16 aggregation operands (f32 accumulation), so its
    # tolerance is looser; orto / zs paths are pure f32 and stay tight.
    assert bool(jnp.allclose(tot_ener, r_ener, rtol=5e-2, atol=5e-1)), (tot_ener, r_ener)
    assert bool(jnp.allclose(tot_orto, r_orto, rtol=2e-3, atol=1e-2)), (tot_orto, r_orto)
    assert bool(jnp.allclose(zs, r_zs, rtol=2e-3, atol=1e-2)), (zs, r_zs)

    print("KERNEL_OK")
</pallas_src>

<mosaic_0001>
module attributes {stable_mosaic.version = 11 : i64} {
  func.func @_matmul_kernel_single_k(%arg0: i32, %arg1: i32, %arg2: memref<48x128xbf16, #tpu.memory_space<vmem>>, %arg3: memref<128x128xbf16, #tpu.memory_space<vmem>>, %arg4: memref<48x128xf32, #tpu.memory_space<vmem>>) attributes {dimension_semantics = [#tpu.dimension_semantics<parallel>, #tpu.dimension_semantics<parallel>], iteration_bounds = array<i64: 1, 1>, scalar_prefetch = 0 : i64, scratch_operands = 0 : i64, tpu.core_type = #tpu.core_type<tc>, window_params = [{transform_indices = @transform_0, window_bounds = array<i64: 48, 128>}, {transform_indices = @transform_1, window_bounds = array<i64: 128, 128>}, {transform_indices = @transform_2, window_bounds = array<i64: 48, 128>}]} {
    %c0 = arith.constant 0 : index
    %c0_0 = arith.constant 0 : index
    %0 = vector.load %arg2[%c0, %c0_0] : memref<48x128xbf16, #tpu.memory_space<vmem>>, vector<48x128xbf16>
    %c0_1 = arith.constant 0 : index
    %c0_2 = arith.constant 0 : index
    %1 = vector.load %arg3[%c0_1, %c0_2] : memref<128x128xbf16, #tpu.memory_space<vmem>>, vector<128x128xbf16>
    %cst = arith.constant dense<0.000000e+00> : vector<48x128xf32>
    %2 = tpu.matmul %0, %1, %cst {dimension_numbers = #tpu.dot_dimension_numbers<[1], [0], [0], [1], [0, 0, 1, 1], [], []>} : vector<48x128xbf16>, vector<128x128xbf16>, vector<48x128xf32> -> vector<48x128xf32>
    %c0_3 = arith.constant 0 : index
    %c0_4 = arith.constant 0 : index
    %3 = vector.load %arg4[%c0_3, %c0_4] : memref<48x128xf32, #tpu.memory_space<vmem>>, vector<48x128xf32>
    tpu.vector_store %arg4[%c0_3, %c0_4], %2 {strides = array<i32>} : memref<48x128xf32, #tpu.memory_space<vmem>>, vector<48x128xf32>,
    return
  }
  func.func @transform_0(%arg0: i32, %arg1: i32) -> (i32, i32) {
    %c0_i32 = arith.constant 0 : i32
    %c0_i32_0 = arith.constant 0 : i32
    return %arg0, %c0_i32 : i32, i32
  }
  func.func @transform_1(%arg0: i32, %arg1: i32) -> (i32, i32) {
    %c0_i32 = arith.constant 0 : i32
    %c0_i32_0 = arith.constant 0 : i32
    return %c0_i32, %arg1 : i32, i32
  }
  func.func @transform_2(%arg0: i32, %arg1: i32) -> (i32, i32) {
    %c0_i32 = arith.constant 0 : i32
    return %arg0, %arg1 : i32, i32
  }
}

</mosaic_0001>

<bundles_post_ra>
// kernel: tpu_custom_call.1
= control target key start
LH: loop header
LB: loop body
LE: loop exit
PB: predicated region body
PF: predicated region fallthrough
CT: control target
= control target key end

     0   :  { %7 = vsyncpa [#allocation3], 0  ;;  %s431_s0 = inlined_call_operand.hbm [shape: bf16[48,128], index: 0, kind: input, shape index: {}]   ;;  %s432_s1 = inlined_call_operand.hbm [shape: bf16[128,128], index: 1, kind: input, shape index: {}]   ;;  %s433_s2 = inlined_call_operand.hbm [shape: f32[48,128], index: 2, kind: output, shape index: {}]  }
   0x1   :  { %8 = vsyncpa [#allocation6], 0 }
   0x2   :  { %9 = vsyncpa [#allocation4], 0  ;;  %s368_s9 = smov [#allocation2]   ;;  %s296_s13 = scalar_lea.hbm %s431_s0, 384 }
   0x3   :  { %s15_s10 = sshll.u32 %s368_s9, 4  ;;  %p297_p0 = scmp.ne.s32.totalorder %s431_s0, %s296_s13  ;;  %s16_s10 = int_to_ptr.vmem [resolvable:$true] %s15_s10 }
   0x4   :  { %p300_p1 = scmp.lt.u32.totalorder %s296_s13, %s431_s0 }
   0x6   :  { %p302_p2 = pnand %p300_p1, %p297_p0 }
   0x8   :  { %305 = shalt.err (!%p302_p2)
}
   0x9   :  { %s306_s18 = scalar_lea.vmem %s16_s10, 384  ;;  %p311_p4 = scmp.lt.s32.totalorder %s16_s10, %s16_s10 }
   0xa   :  { %p307_p3 = scmp.ne.s32.totalorder %s16_s10, %s306_s18  ;;  %p312_p5 = scmp.lt.s32.totalorder %s306_s18, %s306_s18 }
   0xc   :  { %p313_p6 = por %p312_p5, %p311_p4 }
   0xe   :  { %p314_p7 = pnand %p313_p6, %p307_p3 }
  0x10   :  { %317 = shalt.err (!%p314_p7)
}
  0x11   :  { %s369_s19 = smov 64   ;;  %s370_s20 = smov 4  }
  0x12   :  { %21 = dma.hbm_to_vmem [thread:$0]  %s431_s0, 384, %s16_s10, [#allocation3], %s369_s19, %s369_s19, %s370_s20  }
  0x13   :  { %s371_s23 = smov [#allocation5]   ;;  %s318_s27 = scalar_lea.hbm %s432_s1, 1024 }
  0x14   :  { %s27_s24 = sshll.u32 %s371_s23, 4  ;;  %p319_p8 = scmp.ne.s32.totalorder %s432_s1, %s318_s27  ;;  %s28_s24 = int_to_ptr.vmem [resolvable:$true] %s27_s24 }
  0x15   :  { %p322_p9 = scmp.lt.u32.totalorder %s318_s27, %s432_s1 }
  0x17   :  { %p324_p10 = pnand %p322_p9, %p319_p8 }
  0x19   :  { %327 = shalt.err (!%p324_p10)
}
  0x1a   :  { %s328_s4 = scalar_lea.vmem %s28_s24, 1024  ;;  %p333_p12 = scmp.lt.s32.totalorder %s28_s24, %s28_s24 }
  0x1b   :  { %p329_p11 = scmp.ne.s32.totalorder %s28_s24, %s328_s4  ;;  %p334_p13 = scmp.lt.s32.totalorder %s328_s4, %s328_s4 }
  0x1d   :  { %p335_p0 = por %p334_p13, %p333_p12 }
  0x1f   :  { %p336_p1 = pnand %p335_p0, %p329_p11 }
  0x21   :  { %339 = shalt.err (!%p336_p1)
}
  0x22   :  { %33 = dma.hbm_to_vmem [thread:$0]  %s432_s1, 1024, %s28_s24, [#allocation6], %s369_s19, %s369_s19, %s370_s20  }
  0x23   :  { %362 = dma.done.wait [#allocation3], 384  }
  0x24   :  { %363 = vsyncadd [#allocation3], 4294966912 }
  0x25   :  { %364 = dma.done.wait [#allocation6], 1024  }
  0x26   :  { %365 = vsyncadd [#allocation6], 4294966272  ;;  %v372_v0 = vmov 0.0   ;;  %vm373_vm0 = vmmov 0   ;;  %v285_v1 = vld [vmem:[#allocation5] sm:$0xff]   ;;  %v286_v2 = vld [vmem:[#allocation5 + $0x8] sm:$0xff]  }
  0x27   :  { %260 = vmatprep.subr.bf16.mxu1 %v372_v0  ;;  %232 = vmatprep.subr.bf16.mxu0 %v372_v0  ;;  %v287_v3 = vld [vmem:[#allocation5 + $0x10] sm:$0xff]   ;;  %v288_v4 = vld [vmem:[#allocation5 + $0x18] sm:$0xff]   ;;  %v289_v5 = vld [vmem:[#allocation5 + $0x20] sm:$0xff]   ;;  %s374_s1 = smov [#allocation7]  }
  0x28   :  { %252 = vmatprep.mubr.msk.bf16.mxu1 %vm373_vm0, %v372_v0  ;;  %248 = vmatprep.mubr.msk.bf16.mxu0 %vm373_vm0, %v372_v0  ;;  %v290_v6 = vld [vmem:[#allocation5 + $0x28] sm:$0xff]   ;;  %v291_v7 = vld [vmem:[#allocation5 + $0x30] sm:$0xff]   ;;  %v292_v8 = vld [vmem:[#allocation5 + $0x38] sm:$0xff]   ;;  %s197_s6 = sshll.u32 %s374_s1, 4  ;;  %s198_s6 = int_to_ptr.vmem [resolvable:$true] %s197_s6 }
  0x29   :  { %268 = vmatpush3.bf16.msra.mxu1 %v285_v1  ;;  %233 = vmatpush3.bf16.msra.mxu0 %v285_v1  ;;  %v293_v9 = vld [vmem:[#allocation2 + $0x8] sm:$0xff]   ;;  %v294_v10 = vld [vmem:[#allocation2] sm:$0xff]   ;;  %v295_v11 = vld [vmem:[#allocation2 + $0x10] sm:$0xff]   ;;  %s340_s7 = scalar_lea.vmem %s198_s6, 768  ;;  %p345_p3 = scmp.lt.s32.totalorder %s198_s6, %s198_s6 }
  0x2a   :  { %261 = vmatprep.subr.bf16.mxu1 %v372_v0  ;;  %234 = vmatprep.subr.bf16.mxu0 %v372_v0  ;;  %p341_p2 = scmp.ne.s32.totalorder %s198_s6, %s340_s7  ;;  %p346_p4 = scmp.lt.s32.totalorder %s340_s7, %s340_s7 }
  0x2c   :  { %p347_p5 = por %p346_p4, %p345_p3 }
  0x2d   :  { %269 = vmatpush3.bf16.msra.mxu1 %v286_v2  ;;  %235 = vmatpush3.bf16.msra.mxu0 %v286_v2 }
  0x2e   :  { %262 = vmatprep.subr.bf16.mxu1 %v372_v0  ;;  %236 = vmatprep.subr.bf16.mxu0 %v372_v0  ;;  %p348_p6 = pnand %p347_p5, %p341_p2 }
  0x31   :  { %270 = vmatpush3.bf16.msra.mxu1 %v287_v3  ;;  %237 = vmatpush3.bf16.msra.mxu0 %v287_v3 }
  0x32   :  { %263 = vmatprep.subr.bf16.mxu1 %v372_v0  ;;  %238 = vmatprep.subr.bf16.mxu0 %v372_v0 }
  0x35   :  { %271 = vmatpush3.bf16.msra.mxu1 %v288_v4  ;;  %239 = vmatpush3.bf16.msra.mxu0 %v288_v4 }
  0x36   :  { %264 = vmatprep.subr.bf16.mxu1 %v372_v0  ;;  %240 = vmatprep.subr.bf16.mxu0 %v372_v0 }
  0x39   :  { %272 = vmatpush3.bf16.msra.mxu1 %v289_v5  ;;  %241 = vmatpush3.bf16.msra.mxu0 %v289_v5 }
  0x3a   :  { %265 = vmatprep.subr.bf16.mxu1 %v372_v0  ;;  %242 = vmatprep.subr.bf16.mxu0 %v372_v0 }
  0x3d   :  { %273 = vmatpush3.bf16.msra.mxu1 %v290_v6  ;;  %243 = vmatpush3.bf16.msra.mxu0 %v290_v6 }
  0x3e   :  { %266 = vmatprep.subr.bf16.mxu1 %v372_v0  ;;  %244 = vmatprep.subr.bf16.mxu0 %v372_v0 }
  0x41   :  { %274 = vmatpush3.bf16.msra.mxu1 %v291_v7  ;;  %245 = vmatpush3.bf16.msra.mxu0 %v291_v7 }
  0x42   :  { %267 = vmatprep.subr.bf16.mxu1 %v372_v0  ;;  %246 = vmatprep.subr.bf16.mxu0 %v372_v0 }
  0x45   :  { %275 = vmatpush3.bf16.msra.mxu1 %v292_v8  ;;  %247 = vmatpush3.bf16.msra.mxu0 %v292_v8 }
  0x48   :  { %253 = vmatmul.mubr.bf16.vlgmr.msra.gmra.mrb[0].mxu1 %v293_v9  ;;  %249 = vmatmul.mubr.bf16.vlgmr.msra.gmra.mrb[0].mxu0 %v294_v10 }
  0x49   :  { %256 = vmatprep.mubr.msk.bf16.mxu1 %vm373_vm0, %v372_v0 }
  0x50   :  { %257 = vmatmul.mubr.bf16.gmra.mrb[4].mxu1 %v295_v11 }
 0x11b   :  { %v171_v12 = vpop.f32.mrb[0].mxu1  ;;  %v163_v13 = vpop.f32.mrb[0].mxu0 }
 0x11c   :  { %188 = vst [vmem:[#allocation7 + $0x10] sm:$0xff] %v171_v12  ;;  %v254_v14 = vpop.f32.mrb[1].mxu1  ;;  %186 = vst [vmem:[#allocation7] sm:$0xff] %v163_v13  ;;  %v250_v15 = vpop.f32.mrb[1].mxu0 }
 0x11d   :  { %v174_v16 = vpop.f32.mrb[2].mxu1  ;;  %v166_v17 = vpop.f32.mrb[2].mxu0 }
 0x11e   :  { %189 = vst [vmem:[#allocation7 + $0x18] sm:$0xff] %v174_v16  ;;  %v255_v18 = vpop.f32.mrb[3].mxu1  ;;  %187 = vst [vmem:[#allocation7 + $0x8] sm:$0xff] %v166_v17  ;;  %v251_v19 = vpop.f32.mrb[3].mxu0 }
 0x123   :  { %v179_v20 = vpop.f32.mrb[4].mxu1 }
 0x124   :  { %190 = vst [vmem:[#allocation7 + $0x20] sm:$0xff] %v179_v20  ;;  %v258_v21 = vpop.f32.mrb[5].mxu1 }
 0x125   :  { %v182_v22 = vpop.f32.mrb[6].mxu1 }
 0x126   :  { %191 = vst [vmem:[#allocation7 + $0x28] sm:$0xff] %v182_v22  ;;  %v259_v23 = vpop.f32.mrb[7].mxu1 }
 0x127   :  { %351 = shalt.err (!%p348_p6)
}
 0x128   :  { %s352_s10 = scalar_lea.hbm %s433_s2, 768 }
 0x129   :  { %p353_p7 = scmp.ne.s32.totalorder %s433_s2, %s352_s10  ;;  %p356_p8 = scmp.lt.u32.totalorder %s352_s10, %s433_s2 }
 0x12b   :  { %p358_p9 = pnand %p356_p8, %p353_p7 }
 0x12d   :  { %361 = shalt.err (!%p358_p9)
}
 0x12e   :  { %s375_s15 = smov 128   ;;  %s376_s16 = smov 8  }
 0x12f   :  { %203 = dma.vmem_to_hbm [thread:$0]  %s198_s6, 768, %s433_s2, [#allocation4], %s375_s15, %s375_s15, %s376_s16  }
 0x130   :  { %366 = dma.done.wait [#allocation4], 768  }
 0x131   :  { %367 = vsyncadd [#allocation4], 4294966528 }
 0x132   :  { %207 = vsyncpa [#allocation3], 1 }
 0x133   :  { %208 = vsyncpa [#allocation6], 1 }
 0x134   :  { %209 = vsyncpa [#allocation4], 1 }

</bundles_post_ra>
